<compile_context>
chip_gen: v7x
topology: tpu7x:2x2x1
jax: 0.10.0
libtpu: 0.0.40
codegen_flags: <defaults>
</compile_context>

<pallas_src>
import functools
import jax
import jax.numpy as jnp
from jax.experimental import pallas as pl
from jax.experimental.pallas import tpu as pltpu


def _round_up(x: int, m: int) -> int:
    return ((x + m - 1) // m) * m


def _cdiv(a: int, b: int) -> int:
    return -(-a // b)


def _choose_batch_tile(batch: int, sweet: int = 512) -> int:
    """Batch tile: multiple of 8, targets ~`sweet` rows (tiled-DMA efficiency keeps
    improving up to ~512-1024-row tiles), keeps zero-padding small, and yields >= 2
    grid tiles whenever the batch allows so v7x's second TensorCore gets work under
    dimension_semantics=("parallel",)."""
    b8 = _round_up(max(batch, 1), 8)
    if b8 <= 8:
        return 8
    n_tiles = max(2, _cdiv(b8, sweet))            # >= 2 tiles for v7x megacore
    return min(_round_up(_cdiv(b8, n_tiles), 8), b8)


def mlp_prelu_kernel(alpha_ref,          # SMEM (1, 1) f32: shared PReLU slope
                     x_ref,              # VMEM (TB, K)   f32 (cast to bf16 in-kernel)
                     w1_ref, b1_ref,     # (K, Hp) bf16, (1, Hp) f32
                     w2_ref, b2_ref,     # (Hp, Hp) bf16, (1, Hp) f32
                     w3_ref, b3_ref,     # (Hp, Op) bf16, (1, Op) f32
                     out_ref):           # VMEM (TB, Op) f32
    alpha = alpha_ref[0, 0]

    # layer_1: cast x to bf16 on the VPU (hides under the x DMA), f32 accumulate on MXU.
    x_bf = x_ref[...].astype(jnp.bfloat16)
    h = jnp.dot(x_bf, w1_ref[...],
                preferred_element_type=jnp.float32) + b1_ref[...]
    h = h * jnp.where(h >= 0, jnp.float32(1.0), alpha)      # PReLU, f32 VPU (v5e-safe)

    # layer_2 + PReLU
    h = jnp.dot(h.astype(jnp.bfloat16), w2_ref[...],
                preferred_element_type=jnp.float32) + b2_ref[...]
    h = h * jnp.where(h >= 0, jnp.float32(1.0), alpha)

    # layer_3 (no activation)
    o = jnp.dot(h.astype(jnp.bfloat16), w3_ref[...],
                preferred_element_type=jnp.float32) + b3_ref[...]
    out_ref[...] = o.astype(out_ref.dtype)


def pad_params(params):
    """One-time parameter prep (call at init, NOT per forward):
    pad lane dims to multiples of 128 and cast matmul operands to bf16
    (biases and the PReLU slope stay f32)."""
    w1, b1, w2, b2, w3, b3, alpha = params
    in_size, hid = w1.shape
    out_size = w3.shape[1]
    K = _round_up(in_size, 128)
    Hp = _round_up(hid, 128)
    Op = _round_up(out_size, 128)

    def pad2(a, r, c, dtype):
        buf = jnp.zeros((r, c), dtype)
        return buf.at[:a.shape[0], :a.shape[1]].set(a.astype(dtype))

    return (alpha.reshape(1, 1).astype(jnp.float32),
            pad2(w1, K, Hp, jnp.bfloat16), pad2(b1, 1, Hp, jnp.float32),
            pad2(w2, Hp, Hp, jnp.bfloat16), pad2(b2, 1, Hp, jnp.float32),
            pad2(w3, Hp, Op, jnp.bfloat16), pad2(b3, 1, Op, jnp.float32))


@functools.partial(jax.jit, static_argnames=("out_size",))
def baseline_model_forward(x_nchw, padded_params, *, out_size):
    """x_nchw: (B, C, H, W) float32; padded_params = pad_params(params).
    Returns (B, out_size) float32."""
    alpha_p, w1_p, b1_p, w2_p, b2_p, w3_p, b3_p = padded_params
    B = x_nchw.shape[0]
    K, Hp = w1_p.shape
    Op = w3_p.shape[1]

    x_flat = x_nchw.reshape(B, -1)                       # nn.Flatten()
    in_size = x_flat.shape[1]

    TB = _choose_batch_tile(B)
    B_pad = _round_up(B, TB)
    nb = B_pad // TB

    # Feed x as f32 straight into the kernel (no separate HBM pre-cast pass).
    # Only pad the batch remainder / feature tail with zeros when actually needed.
    if B_pad != B or K != in_size:
        x_flat = jnp.pad(x_flat, ((0, B_pad - B), (0, K - in_size)))

    flops = 2 * B_pad * (K * Hp + Hp * Hp + Hp * Op)
    bytes_accessed = (B_pad * K * 4
                      + (w1_p.size + w2_p.size + w3_p.size) * 2
                      + (b1_p.size + b2_p.size + b3_p.size) * 4
                      + B_pad * Op * 4)

    # VMEM budget: x/out tiles double-buffered + weights (default double-buffer,
    # <1 MiB here). Re-derived per call so large TB / in_size stays well inside
    # v7x's 64 MiB physical VMEM; never set below the smallest scoped default.
    vmem_bytes = (2 * TB * (K + Op) * 4
                  + 2 * ((w1_p.size + w2_p.size + w3_p.size) * 2
                         + (b1_p.size + b2_p.size + b3_p.size) * 4))
    vmem_limit = min(max(2 * vmem_bytes, 16 * 1024 * 1024), 48 * 1024 * 1024)

    grid_spec = pltpu.PrefetchScalarGridSpec(
        num_scalar_prefetch=0,
        grid=(nb,),
        in_specs=[
            # shared PReLU slope -> scalar path
            pl.BlockSpec((1, 1), lambda i: (0, 0),
                         memory_space=pltpu.MemorySpace.SMEM),
            # activations stream per batch tile (f32, cast in-kernel)
            pl.BlockSpec((TB, K), lambda i: (i, 0)),
            # weights / biases: constant index_map -> VMEM-resident across tiles.
            pl.BlockSpec((K, Hp), lambda i: (0, 0)),
            pl.BlockSpec((1, Hp), lambda i: (0, 0)),
            pl.BlockSpec((Hp, Hp), lambda i: (0, 0)),
            pl.BlockSpec((1, Hp), lambda i: (0, 0)),
            pl.BlockSpec((Hp, Op), lambda i: (0, 0)),
            pl.BlockSpec((1, Op), lambda i: (0, 0)),
        ],
        out_specs=pl.BlockSpec((TB, Op), lambda i: (i, 0)),
    )

    out_p = pl.pallas_call(
        mlp_prelu_kernel,
        out_shape=jax.ShapeDtypeStruct((B_pad, Op), jnp.float32),
        grid_spec=grid_spec,
        compiler_params=pltpu.CompilerParams(
            dimension_semantics=("parallel",),           # shard batch tiles across TCs
            vmem_limit_bytes=vmem_limit),
        cost_estimate=pl.CostEstimate(
            flops=flops, transcendentals=0, bytes_accessed=bytes_accessed),
    )(alpha_p, x_flat, w1_p, b1_p, w2_p, b2_p, w3_p, b3_p)

    return out_p[:B, :out_size]                          # sliced inside jit -> fused


def init_params(key, input_size, hidden_units, output_size):
    """Deterministic synthetic params (shapes match the torch module).
    Linear weights stored transposed: (in_features, out_features)."""
    k1, k2, k3, k4, k5, k6 = jax.random.split(key, 6)
    w1 = jax.random.normal(k1, (input_size, hidden_units), jnp.float32) * 0.05
    b1 = jax.random.normal(k2, (1, hidden_units), jnp.float32) * 0.05
    w2 = jax.random.normal(k3, (hidden_units, hidden_units), jnp.float32) * 0.05
    b2 = jax.random.normal(k4, (1, hidden_units), jnp.float32) * 0.05
    w3 = jax.random.normal(k5, (hidden_units, output_size), jnp.float32) * 0.05
    b3 = jax.random.normal(k6, (1, output_size), jnp.float32) * 0.05
    alpha = jnp.array([0.25], dtype=jnp.float32)         # nn.PReLU() default init
    return (w1, b1, w2, b2, w3, b3, alpha)


def reference_forward(x_nchw, params):
    """Pure-JAX f32 reference for correctness check."""
    w1, b1, w2, b2, w3, b3, alpha = params
    a = alpha[0]
    x = x_nchw.reshape(x_nchw.shape[0], -1)
    h = x @ w1 + b1
    h = jnp.where(h >= 0, h, a * h)
    h = h @ w2 + b2
    h = jnp.where(h >= 0, h, a * h)
    return h @ w3 + b3


if __name__ == "__main__":
    # batch=2, 4 channels, 16x16 spatial => input_size = 1024, hidden=32, out=10
    B, C, H, W = 2, 4, 16, 16
    input_size = C * H * W
    hidden_units = 32
    output_size = 10

    key = jax.random.PRNGKey(0)
    kx, kp = jax.random.split(key)
    x = jax.random.normal(kx, (B, C, H, W), jnp.float32)
    params = init_params(kp, input_size, hidden_units, output_size)

    padded_params = pad_params(params)                   # one-time, hoisted out of fwd
    out = baseline_model_forward(x, padded_params, out_size=output_size)
    out = jax.block_until_ready(out)

    ref = reference_forward(x, params)
    assert out.shape == (B, output_size)
    # Tolerance relaxed vs the f32 reference because MXU operands are bf16
    # (accumulation remains f32 via preferred_element_type).
    assert jnp.allclose(out, ref, atol=2e-2, rtol=2e-2), \
        f"max abs diff {jnp.max(jnp.abs(out - ref))}"

    print("KERNEL_OK")
</pallas_src>

<mosaic_0001>
module attributes {stable_mosaic.version = 11 : i64} {
  func.func @mlp_prelu_kernel(%arg0: i32, %arg1: memref<1x1xf32, #tpu.memory_space<smem>>, %arg2: memref<8x1024xf32, #tpu.memory_space<vmem>>, %arg3: memref<1024x128xbf16, #tpu.memory_space<vmem>>, %arg4: memref<1x128xf32, #tpu.memory_space<vmem>>, %arg5: memref<128x128xbf16, #tpu.memory_space<vmem>>, %arg6: memref<1x128xf32, #tpu.memory_space<vmem>>, %arg7: memref<128x128xbf16, #tpu.memory_space<vmem>>, %arg8: memref<1x128xf32, #tpu.memory_space<vmem>>, %arg9: memref<8x128xf32, #tpu.memory_space<vmem>>) attributes {dimension_semantics = [#tpu.dimension_semantics<parallel>], iteration_bounds = array<i64: 1>, scalar_prefetch = 0 : i64, scratch_operands = 0 : i64, tpu.core_type = #tpu.core_type<tc>, window_params = [{transform_indices = @transform_0, window_bounds = array<i64: 1, 1>}, {transform_indices = @transform_1, window_bounds = array<i64: 8, 1024>}, {pipeline_mode = #tpu.pipeline_mode<synchronous>, transform_indices = @transform_2, window_bounds = array<i64: 1024, 128>}, {pipeline_mode = #tpu.pipeline_mode<synchronous>, transform_indices = @transform_3, window_bounds = array<i64: 1, 128>}, {pipeline_mode = #tpu.pipeline_mode<synchronous>, transform_indices = @transform_4, window_bounds = array<i64: 128, 128>}, {pipeline_mode = #tpu.pipeline_mode<synchronous>, transform_indices = @transform_5, window_bounds = array<i64: 1, 128>}, {pipeline_mode = #tpu.pipeline_mode<synchronous>, transform_indices = @transform_6, window_bounds = array<i64: 128, 128>}, {pipeline_mode = #tpu.pipeline_mode<synchronous>, transform_indices = @transform_7, window_bounds = array<i64: 1, 128>}, {transform_indices = @transform_8, window_bounds = array<i64: 8, 128>}]} {
    %c0 = arith.constant 0 : index
    %c0_0 = arith.constant 0 : index
    %0 = memref.load %arg1[%c0, %c0_0] : memref<1x1xf32, #tpu.memory_space<smem>>
    %c0_1 = arith.constant 0 : index
    %c0_2 = arith.constant 0 : index
    %1 = vector.load %arg2[%c0_1, %c0_2] : memref<8x1024xf32, #tpu.memory_space<vmem>>, vector<8x1024xf32>
    %2 = arith.truncf %1 : vector<8x1024xf32> to vector<8x1024xbf16>
    %c0_3 = arith.constant 0 : index
    %c0_4 = arith.constant 0 : index
    %3 = vector.load %arg3[%c0_3, %c0_4] : memref<1024x128xbf16, #tpu.memory_space<vmem>>, vector<1024x128xbf16>
    %cst = arith.constant dense<0.000000e+00> : vector<8x128xf32>
    %4 = tpu.matmul %2, %3, %cst {dimension_numbers = #tpu.dot_dimension_numbers<[1], [0], [0], [1], [0, 0, 1, 1], [], []>} : vector<8x1024xbf16>, vector<1024x128xbf16>, vector<8x128xf32> -> vector<8x128xf32>
    %c0_5 = arith.constant 0 : index
    %c0_6 = arith.constant 0 : index
    %5 = vector.load %arg4[%c0_5, %c0_6] : memref<1x128xf32, #tpu.memory_space<vmem>>, vector<1x128xf32>
    %6 = vector.broadcast %5 : vector<1x128xf32> to vector<8x128xf32>
    %7 = arith.addf %4, %6 : vector<8x128xf32>
    %cst_7 = arith.constant 0.000000e+00 : f32
    %8 = vector.broadcast %cst_7 : f32 to vector<8x128xf32>
    %9 = arith.cmpf oge, %7, %8 : vector<8x128xf32>
    %cst_8 = arith.constant 1.000000e+00 : f32
    %10 = vector.broadcast %cst_8 : f32 to vector<8x128xf32>
    %11 = vector.broadcast %0 : f32 to vector<8x128xf32>
    %12 = arith.select %9, %10, %11 : vector<8x128xi1>, vector<8x128xf32>
    %13 = arith.mulf %7, %12 : vector<8x128xf32>
    %14 = arith.truncf %13 : vector<8x128xf32> to vector<8x128xbf16>
    %c0_9 = arith.constant 0 : index
    %c0_10 = arith.constant 0 : index
    %15 = vector.load %arg5[%c0_9, %c0_10] : memref<128x128xbf16, #tpu.memory_space<vmem>>, vector<128x128xbf16>
    %cst_11 = arith.constant dense<0.000000e+00> : vector<8x128xf32>
    %16 = tpu.matmul %14, %15, %cst_11 {dimension_numbers = #tpu.dot_dimension_numbers<[1], [0], [0], [1], [0, 0, 1, 1], [], []>} : vector<8x128xbf16>, vector<128x128xbf16>, vector<8x128xf32> -> vector<8x128xf32>
    %c0_12 = arith.constant 0 : index
    %c0_13 = arith.constant 0 : index
    %17 = vector.load %arg6[%c0_12, %c0_13] : memref<1x128xf32, #tpu.memory_space<vmem>>, vector<1x128xf32>
    %18 = vector.broadcast %17 : vector<1x128xf32> to vector<8x128xf32>
    %19 = arith.addf %16, %18 : vector<8x128xf32>
    %cst_14 = arith.constant 0.000000e+00 : f32
    %20 = vector.broadcast %cst_14 : f32 to vector<8x128xf32>
    %21 = arith.cmpf oge, %19, %20 : vector<8x128xf32>
    %cst_15 = arith.constant 1.000000e+00 : f32
    %22 = vector.broadcast %cst_15 : f32 to vector<8x128xf32>
    %23 = vector.broadcast %0 : f32 to vector<8x128xf32>
    %24 = arith.select %21, %22, %23 : vector<8x128xi1>, vector<8x128xf32>
    %25 = arith.mulf %19, %24 : vector<8x128xf32>
    %26 = arith.truncf %25 : vector<8x128xf32> to vector<8x128xbf16>
    %c0_16 = arith.constant 0 : index
    %c0_17 = arith.constant 0 : index
    %27 = vector.load %arg7[%c0_16, %c0_17] : memref<128x128xbf16, #tpu.memory_space<vmem>>, vector<128x128xbf16>
    %cst_18 = arith.constant dense<0.000000e+00> : vector<8x128xf32>
    %28 = tpu.matmul %26, %27, %cst_18 {dimension_numbers = #tpu.dot_dimension_numbers<[1], [0], [0], [1], [0, 0, 1, 1], [], []>} : vector<8x128xbf16>, vector<128x128xbf16>, vector<8x128xf32> -> vector<8x128xf32>
    %c0_19 = arith.constant 0 : index
    %c0_20 = arith.constant 0 : index
    %29 = vector.load %arg8[%c0_19, %c0_20] : memref<1x128xf32, #tpu.memory_space<vmem>>, vector<1x128xf32>
    %30 = vector.broadcast %29 : vector<1x128xf32> to vector<8x128xf32>
    %31 = arith.addf %28, %30 : vector<8x128xf32>
    %c0_21 = arith.constant 0 : index
    %c0_22 = arith.constant 0 : index
    %32 = vector.load %arg9[%c0_21, %c0_22] : memref<8x128xf32, #tpu.memory_space<vmem>>, vector<8x128xf32>
    tpu.vector_store %arg9[%c0_21, %c0_22], %31 {strides = array<i32>} : memref<8x128xf32, #tpu.memory_space<vmem>>, vector<8x128xf32>,
    return
  }
  func.func @transform_0(%arg0: i32) -> (i32, i32) {
    %c0_i32 = arith.constant 0 : i32
    %c0_i32_0 = arith.constant 0 : i32
    %c0_i32_1 = arith.constant 0 : i32
    return %c0_i32, %c0_i32_0 : i32, i32
  }
  func.func @transform_1(%arg0: i32) -> (i32, i32) {
    %c0_i32 = arith.constant 0 : i32
    %c0_i32_0 = arith.constant 0 : i32
    return %arg0, %c0_i32 : i32, i32
  }
  func.func @transform_2(%arg0: i32) -> (i32, i32) {
    %c0_i32 = arith.constant 0 : i32
    %c0_i32_0 = arith.constant 0 : i32
    %c0_i32_1 = arith.constant 0 : i32
    return %c0_i32, %c0_i32_0 : i32, i32
  }
  func.func @transform_3(%arg0: i32) -> (i32, i32) {
    %c0_i32 = arith.constant 0 : i32
    %c0_i32_0 = arith.constant 0 : i32
    %c0_i32_1 = arith.constant 0 : i32
    return %c0_i32, %c0_i32_0 : i32, i32
  }
  func.func @transform_4(%arg0: i32) -> (i32, i32) {
    %c0_i32 = arith.constant 0 : i32
    %c0_i32_0 = arith.constant 0 : i32
    %c0_i32_1 = arith.constant 0 : i32
    return %c0_i32, %c0_i32_0 : i32, i32
  }
  func.func @transform_5(%arg0: i32) -> (i32, i32) {
    %c0_i32 = arith.constant 0 : i32
    %c0_i32_0 = arith.constant 0 : i32
    %c0_i32_1 = arith.constant 0 : i32
    return %c0_i32, %c0_i32_0 : i32, i32
  }
  func.func @transform_6(%arg0: i32) -> (i32, i32) {
    %c0_i32 = arith.constant 0 : i32
    %c0_i32_0 = arith.constant 0 : i32
    %c0_i32_1 = arith.constant 0 : i32
    return %c0_i32, %c0_i32_0 : i32, i32
  }
  func.func @transform_7(%arg0: i32) -> (i32, i32) {
    %c0_i32 = arith.constant 0 : i32
    %c0_i32_0 = arith.constant 0 : i32
    %c0_i32_1 = arith.constant 0 : i32
    return %c0_i32, %c0_i32_0 : i32, i32
  }
  func.func @transform_8(%arg0: i32) -> (i32, i32) {
    %c0_i32 = arith.constant 0 : i32
    %c0_i32_0 = arith.constant 0 : i32
    return %arg0, %c0_i32 : i32, i32
  }
}

</mosaic_0001>

<bundles_post_ra>
// kernel: baseline_model_forward.1
= control target key start
LH: loop header
LB: loop body
LE: loop exit
PB: predicated region body
PF: predicated region fallthrough
CT: control target
= control target key end

     0   :  { %14 = vsyncpa [#allocation4], 0  ;;  %s1316_s27 = smov [#allocation3]   ;;  %s1483_s0 = inlined_call_operand.<no memory space> [shape: f32[1,1], index: 0, kind: input, shape index: {}]   ;;  %s1484_s1 = inlined_call_operand.vmem [shape: f32[8,1024], index: 1, kind: input, shape index: {}]   ;;  %s1485_s2 = inlined_call_operand.hbm [shape: bf16[1024,128], index: 2, kind: input, shape index: {}]   ;;  %s1486_s3 = inlined_call_operand.vmem [shape: f32[1,128], index: 3, kind: input, shape index: {}]   ;;  %s1487_s4 = inlined_call_operand.vmem [shape: bf16[128,128], index: 4, kind: input, shape index: {}]   ;;  %s1488_s5 = inlined_call_operand.vmem [shape: f32[1,128], index: 5, kind: input, shape index: {}]   ;;  %s1489_s6 = inlined_call_operand.vmem [shape: bf16[128,128], index: 6, kind: input, shape index: {}]   ;;  %s1490_s7 = inlined_call_operand.vmem [shape: f32[1,128], index: 7, kind: input, shape index: {}]   ;;  %s1491_s8 = inlined_call_operand.vmem [shape: f32[8,128], index: 8, kind: output, shape index: {}]  }
   0x1   :  { %s24_s28 = sshll.u32 %s1316_s27, 4  ;;  %s1292_s9 = scalar_lea.hbm %s1485_s2, 8192  ;;  %s25_s28 = int_to_ptr.vmem [resolvable:$true] %s24_s28 }
   0x2   :  { %p1293_p0 = scmp.ne.s32.totalorder %s1485_s2, %s1292_s9  ;;  %p1296_p1 = scmp.lt.u32.totalorder %s1292_s9, %s1485_s2 }
   0x4   :  { %p1298_p2 = pnand %p1296_p1, %p1293_p0 }
   0x6   :  { %1301 = shalt.err (!%p1298_p2)
}
   0x7   :  { %s1302_s14 = scalar_lea.vmem %s25_s28, 8192  ;;  %p1307_p4 = scmp.lt.s32.totalorder %s25_s28, %s25_s28 }
   0x8   :  { %p1303_p3 = scmp.ne.s32.totalorder %s25_s28, %s1302_s14  ;;  %p1308_p5 = scmp.lt.s32.totalorder %s1302_s14, %s1302_s14 }
   0xa   :  { %p1309_p6 = por %p1308_p5, %p1307_p4 }
   0xc   :  { %p1310_p7 = pnand %p1309_p6, %p1303_p3 }
   0xe   :  { %1313 = shalt.err (!%p1310_p7)
}
   0xf   :  { %s1317_s15 = smov 64   ;;  %s1318_s16 = smov 4  }
  0x10   :  { %30 = dma.hbm_to_vmem [thread:$0]  %s1485_s2, 8192, %s25_s28, [#allocation4], %s1317_s15, %s1317_s15, %s1318_s16  }
  0x11   :  { %1314 = dma.done.wait [#allocation4], 8192  }
  0x12   :  { %1315 = vsyncadd [#allocation4], 4294959104  ;;  %v1212_v0 = vld [vmem:[#allocation3 + $0x40] sm:$0xff]   ;;  %v1216_v4 = vld [vmem:[#allocation3 + $0x48] sm:$0xff]   ;;  %vm1320_vm0 = vmmov 0  }
  0x13   :  { %v1213_v1 = vld [vmem:[#allocation3 + $0xc0] sm:$0xff]   ;;  %1061 = vmatprep.subr.bf16.mxu0 %v1212_v0  ;;  %v1217_v5 = vld [vmem:[#allocation3 + $0xc8] sm:$0xff]   ;;  %v1220_v8 = vld [vmem:[#allocation3 + $0x50] sm:$0xff]  }
  0x14   :  { %v1214_v2 = vld [vmem:[#allocation3] sm:$0xff]   ;;  %1083 = vmatprep.subr.bf16.mxu1 %v1213_v1  ;;  %v1218_v6 = vld [vmem:[#allocation3 + $0x8] sm:$0xff]   ;;  %v1221_v9 = vld [vmem:[#allocation3 + $0xd0] sm:$0xff]  }
  0x15   :  { %v1215_v3 = vld [vmem:[#allocation3 + $0x80] sm:$0xff]   ;;  %1062 = vmatpush3.bf16.msra.mxu0 %v1214_v2  ;;  %v1219_v7 = vld [vmem:[#allocation3 + $0x88] sm:$0xff]   ;;  %v1222_v10 = vld [vmem:[#allocation3 + $0x10] sm:$0xff]  }
  0x16   :  { %1084 = vmatpush3.bf16.msra.mxu1 %v1215_v3  ;;  %1063 = vmatprep.subr.bf16.mxu0 %v1216_v4  ;;  %v1223_v11 = vld [vmem:[#allocation3 + $0x90] sm:$0xff]   ;;  %v1224_v12 = vld [vmem:[#allocation3 + $0x58] sm:$0xff]   ;;  %v1228_v16 = vld [vmem:[#allocation3 + $0x60] sm:$0xff]  }
  0x17   :  { %1085 = vmatprep.subr.bf16.mxu1 %v1217_v5  ;;  %v1225_v13 = vld [vmem:[#allocation3 + $0xd8] sm:$0xff]   ;;  %v1229_v17 = vld [vmem:[#allocation3 + $0xe0] sm:$0xff]   ;;  %v1232_v20 = vld [vmem:[#allocation3 + $0x68] sm:$0xff]  }
  0x18   :  { %v1226_v14 = vld [vmem:[#allocation3 + $0x18] sm:$0xff]   ;;  %v1230_v18 = vld [vmem:[#allocation3 + $0x20] sm:$0xff]   ;;  %v1233_v21 = vld [vmem:[#allocation3 + $0xe8] sm:$0xff]  }
  0x19   :  { %1064 = vmatpush3.bf16.msra.mxu0 %v1218_v6  ;;  %v1227_v15 = vld [vmem:[#allocation3 + $0x98] sm:$0xff]   ;;  %v1231_v19 = vld [vmem:[#allocation3 + $0xa0] sm:$0xff]   ;;  %v1234_v22 = vld [vmem:[#allocation3 + $0x28] sm:$0xff]  }
  0x1a   :  { %1086 = vmatpush3.bf16.msra.mxu1 %v1219_v7  ;;  %1065 = vmatprep.subr.bf16.mxu0 %v1220_v8  ;;  %v1235_v23 = vld [vmem:[#allocation3 + $0xa8] sm:$0xff]   ;;  %v1236_v24 = vld [vmem:[#allocation3 + $0x70] sm:$0xff]   ;;  %v1240_v28 = vld [vmem:[#allocation3 + $0x78] sm:$0xff]  }
  0x1b   :  { %1087 = vmatprep.subr.bf16.mxu1 %v1221_v9  ;;  %v1237_v25 = vld [vmem:[#allocation3 + $0xf0] sm:$0xff]   ;;  %v1241_v29 = vld [vmem:[#allocation3 + $0xf8] sm:$0xff]   ;;  %v47_v32 = vld [vmem:[%s1484_s1 + $0x8] sm:$0xff] }
  0x1c   :  { %v1238_v26 = vld [vmem:[#allocation3 + $0x30] sm:$0xff]   ;;  %v1242_v30 = vld [vmem:[#allocation3 + $0x38] sm:$0xff]   ;;  %v46_v34 = vld [vmem:[%s1484_s1] sm:$0xff]  ;;  %v55_v35 = vpack.c.bf16 %v47_v32, %v47_v32 }
  0x1d   :  { %1066 = vmatpush3.bf16.msra.mxu0 %v1222_v10  ;;  %v1239_v27 = vld [vmem:[#allocation3 + $0xb0] sm:$0xff]   ;;  %v1243_v31 = vld [vmem:[#allocation3 + $0xb8] sm:$0xff]   ;;  %v54_v37 = vpack.c.bf16 %v46_v34, %v46_v34  ;;  %v1244_v40 = vld [vmem:[#allocation3 + $0x140] sm:$0xff]  }
  0x1e   :  { %1088 = vmatpush3.bf16.msra.mxu1 %v1223_v11  ;;  %1067 = vmatprep.subr.bf16.mxu0 %v1224_v12  ;;  %v49_v33 = vld [vmem:[%s1484_s1 + $0x18] sm:$0xff]  ;;  %v48_v38 = vld [vmem:[%s1484_s1 + $0x10] sm:$0xff]  ;;  %v1245_v41 = vld [vmem:[#allocation3 + $0x1c0] sm:$0xff]  }
  0x1f   :  { %1089 = vmatprep.subr.bf16.mxu1 %v1225_v13  ;;  %v57_v36 = vpack.c.bf16 %v49_v33, %v49_v33  ;;  %v56_v39 = vpack.c.bf16 %v48_v38, %v48_v38  ;;  %613 = vmatprep.mubr.bf16.mxu0 %v55_v35  ;;  %v1246_v42 = vld [vmem:[#allocation3 + $0x100] sm:$0xff]   ;;  %v1248_v44 = vld [vmem:[#allocation3 + $0x148] sm:$0xff]   ;;  %v1252_v48 = vld [vmem:[#allocation3 + $0x150] sm:$0xff]  }
  0x20   :  { %v1247_v43 = vld [vmem:[#allocation3 + $0x180] sm:$0xff]   ;;  %v1249_v45 = vld [vmem:[#allocation3 + $0x1c8] sm:$0xff]   ;;  %v1253_v49 = vld [vmem:[#allocation3 + $0x1d0] sm:$0xff]  }
  0x21   :  { %1068 = vmatpush3.bf16.msra.mxu0 %v1226_v14  ;;  %653 = vmatprep.mubr.bf16.mxu1 %v57_v36  ;;  %v1250_v46 = vld [vmem:[#allocation3 + $0x108] sm:$0xff]   ;;  %v1254_v50 = vld [vmem:[#allocation3 + $0x110] sm:$0xff]   ;;  %v1256_v52 = vld [vmem:[#allocation3 + $0x158] sm:$0xff]  }
  0x22   :  { %1090 = vmatpush3.bf16.msra.mxu1 %v1227_v15  ;;  %1069 = vmatprep.subr.bf16.mxu0 %v1228_v16  ;;  %v1251_v47 = vld [vmem:[#allocation3 + $0x188] sm:$0xff]   ;;  %v1255_v51 = vld [vmem:[#allocation3 + $0x190] sm:$0xff]   ;;  %v1257_v53 = vld [vmem:[#allocation3 + $0x1d8] sm:$0xff]  }
  0x23   :  { %1091 = vmatprep.subr.bf16.mxu1 %v1229_v17  ;;  %v1258_v54 = vld [vmem:[#allocation3 + $0x118] sm:$0xff]   ;;  %v1260_v56 = vld [vmem:[#allocation3 + $0x160] sm:$0xff]   ;;  %v1264_v60 = vld [vmem:[#allocation3 + $0x168] sm:$0xff]   ;;  %v1319_v17 = vmov 0.0  }
  0x24   :  { %v1259_v55 = vld [vmem:[#allocation3 + $0x198] sm:$0xff]   ;;  %v1261_v57 = vld [vmem:[#allocation3 + $0x1e0] sm:$0xff]   ;;  %v1265_v61 = vld [vmem:[#allocation3 + $0x1e8] sm:$0xff]  }
  0x25   :  { %1070 = vmatpush3.bf16.msra.mxu0 %v1230_v18  ;;  %v1262_v58 = vld [vmem:[#allocation3 + $0x120] sm:$0xff]   ;;  %v1266_v62 = vld [vmem:[#allocation3 + $0x128] sm:$0xff]   ;;  %v1268_v0 = vld [vmem:[#allocation3 + $0x170] sm:$0xff]  }
  0x26   :  { %1092 = vmatpush3.bf16.msra.mxu1 %v1231_v19  ;;  %1071 = vmatprep.subr.bf16.mxu0 %v1232_v20  ;;  %v1263_v59 = vld [vmem:[#allocation3 + $0x1a0] sm:$0xff]   ;;  %v1267_v63 = vld [vmem:[#allocation3 + $0x1a8] sm:$0xff]   ;;  %v1269_v1 = vld [vmem:[#allocation3 + $0x1f0] sm:$0xff]  }
  0x27   :  { %1093 = vmatprep.subr.bf16.mxu1 %v1233_v21  ;;  %v1270_v2 = vld [vmem:[#allocation3 + $0x130] sm:$0xff]   ;;  %v1272_v4 = vld [vmem:[#allocation3 + $0x178] sm:$0xff]   ;;  %v51_v8 = vld [vmem:[%s1484_s1 + $0x28] sm:$0xff] }
  0x28   :  { %v1271_v3 = vld [vmem:[#allocation3 + $0x1b0] sm:$0xff]   ;;  %v1273_v5 = vld [vmem:[#allocation3 + $0x1f8] sm:$0xff]   ;;  %v59_v10 = vpack.c.bf16 %v51_v8, %v51_v8  ;;  %v50_v12 = vld [vmem:[%s1484_s1 + $0x20] sm:$0xff] }
  0x29   :  { %1072 = vmatpush3.bf16.msra.mxu0 %v1234_v22  ;;  %v1274_v6 = vld [vmem:[#allocation3 + $0x138] sm:$0xff]   ;;  %v52_v13 = vld [vmem:[%s1484_s1 + $0x30] sm:$0xff]  ;;  %v58_v14 = vpack.c.bf16 %v50_v12, %v50_v12  ;;  %v1276_v16 = vld [vmem:[%s1487_s4] sm:$0xff]  }
  0x2a   :  { %1094 = vmatpush3.bf16.msra.mxu1 %v1235_v23  ;;  %1073 = vmatprep.subr.bf16.mxu0 %v1236_v24  ;;  %v1275_v7 = vld [vmem:[#allocation3 + $0x1b8] sm:$0xff]   ;;  %v60_v15 = vpack.c.bf16 %v52_v13, %v52_v13  ;;  %v1277_v18 = vld [vmem:[%s1487_s4 + $0x8] sm:$0xff]   ;;  %v1278_v19 = vld [vmem:[%s1487_s4 + $0x10] sm:$0xff]  }
  0x2b   :  { %1095 = vmatprep.subr.bf16.mxu1 %v1237_v25  ;;  %v53_v9 = vld [vmem:[%s1484_s1 + $0x38] sm:$0xff]  ;;  %v1280_v21 = vld [vmem:[%s1487_s4 + $0x20] sm:$0xff]   ;;  %v1281_v22 = vld [vmem:[%s1487_s4 + $0x28] sm:$0xff]  }
  0x2c   :  { %v61_v11 = vpack.c.bf16 %v53_v9, %v53_v9  ;;  %v1279_v20 = vld [vmem:[%s1487_s4 + $0x18] sm:$0xff]   ;;  %v1282_v23 = vld [vmem:[%s1487_s4 + $0x30] sm:$0xff]   ;;  %v1284_v25 = vld [vmem:[%s1489_s6] sm:$0xff]  }
  0x2d   :  { %1074 = vmatpush3.bf16.msra.mxu0 %v1238_v26  ;;  %v1283_v24 = vld [vmem:[%s1487_s4 + $0x38] sm:$0xff]   ;;  %v1285_v26 = vld [vmem:[%s1489_s6 + $0x8] sm:$0xff]   ;;  %v978_v33 = vld [vmem:[%s1486_s3] ss:$0 sm:$0xff] }
  0x2e   :  { %1096 = vmatpush3.bf16.msra.mxu1 %v1239_v27  ;;  %1075 = vmatprep.subr.bf16.mxu0 %v1240_v28  ;;  %v1286_v27 = vld [vmem:[%s1489_s6 + $0x10] sm:$0xff]   ;;  %v1287_v28 = vld [vmem:[%s1489_s6 + $0x18] sm:$0xff]  }
  0x2f   :  { %1097 = vmatprep.subr.bf16.mxu1 %v1241_v29  ;;  %v1288_v29 = vld [vmem:[%s1489_s6 + $0x20] sm:$0xff]  }
  0x31   :  { %1076 = vmatpush3.bf16.msra.mxu0 %v1242_v30  ;;  %v1289_v30 = vld [vmem:[%s1489_s6 + $0x28] sm:$0xff]  }
  0x32   :  { %1098 = vmatpush3.bf16.msra.mxu1 %v1243_v31  ;;  %1105 = vmatprep.subr.bf16.mxu0 %v1244_v40 }
  0x33   :  { %1127 = vmatprep.subr.bf16.mxu1 %v1245_v41 }
  0x34   :  { %614 = vmatmul.mubr.bf16.vlgmr.msra.gmra.mrb[0].mxu0 %v54_v37 }
  0x35   :  { %654 = vmatmul.mubr.bf16.vlgmr.msra.gmra.mrb[0].mxu1 %v56_v39  ;;  %1106 = vmatpush3.bf16.msra.mxu0 %v1246_v42 }
  0x36   :  { %1128 = vmatpush3.bf16.msra.mxu1 %v1247_v43  ;;  %1107 = vmatprep.subr.bf16.mxu0 %v1248_v44 }
  0x37   :  { %1129 = vmatprep.subr.bf16.mxu1 %v1249_v45  ;;  %693 = vmatprep.mubr.bf16.mxu0 %v59_v10 }
  0x38   :  { %733 = vmatprep.mubr.bf16.mxu1 %v61_v11 }
  0x39   :  { %1108 = vmatpush3.bf16.msra.mxu0 %v1250_v46 }
  0x3a   :  { %1130 = vmatpush3.bf16.msra.mxu1 %v1251_v47  ;;  %1109 = vmatprep.subr.bf16.mxu0 %v1252_v48 }
  0x3b   :  { %1131 = vmatprep.subr.bf16.mxu1 %v1253_v49 }
  0x3d   :  { %1110 = vmatpush3.bf16.msra.mxu0 %v1254_v50 }
  0x3e   :  { %1132 = vmatpush3.bf16.msra.mxu1 %v1255_v51  ;;  %1111 = vmatprep.subr.bf16.mxu0 %v1256_v52 }
  0x3f   :  { %1133 = vmatprep.subr.bf16.mxu1 %v1257_v53 }
  0x41   :  { %1112 = vmatpush3.bf16.msra.mxu0 %v1258_v54 }
  0x42   :  { %1134 = vmatpush3.bf16.msra.mxu1 %v1259_v55  ;;  %1113 = vmatprep.subr.bf16.mxu0 %v1260_v56  ;;  %v742_v56 = vstv %s1483_s0 }
  0x43   :  { %1135 = vmatprep.subr.bf16.mxu1 %v1261_v57 }
  0x45   :  { %1114 = vmatpush3.bf16.msra.mxu0 %v1262_v58 }
  0x46   :  { %1136 = vmatpush3.bf16.msra.mxu1 %v1263_v59  ;;  %1115 = vmatprep.subr.bf16.mxu0 %v1264_v60  ;;  %v1290_v60 = vld [vmem:[%s1489_s6 + $0x30] sm:$0xff]  }
  0x47   :  { %1137 = vmatprep.subr.bf16.mxu1 %v1265_v61  ;;  %v1291_v61 = vld [vmem:[%s1489_s6 + $0x38] sm:$0xff]  }
  0x49   :  { %1116 = vmatpush3.bf16.msra.mxu0 %v1266_v62  ;;  %v1043_v62 = vld [vmem:[%s1488_s5] ss:$0 sm:$0xff] }
  0x4a   :  { %1138 = vmatpush3.bf16.msra.mxu1 %v1267_v63  ;;  %1117 = vmatprep.subr.bf16.mxu0 %v1268_v0 }
  0x4b   :  { %1139 = vmatprep.subr.bf16.mxu1 %v1269_v1 }
  0x4d   :  { %1118 = vmatpush3.bf16.msra.mxu0 %v1270_v2 }
  0x4e   :  { %1140 = vmatpush3.bf16.msra.mxu1 %v1271_v3  ;;  %1119 = vmatprep.subr.bf16.mxu0 %v1272_v4 }
  0x4f   :  { %1141 = vmatprep.subr.bf16.mxu1 %v1273_v5 }
  0x51   :  { %1120 = vmatpush3.bf16.msra.mxu0 %v1274_v6 }
  0x52   :  { %1142 = vmatpush3.bf16.msra.mxu1 %v1275_v7  ;;  %1167 = vmatprep.subr.bf16.mxu0 %v1319_v17  ;;  %v1052_v7 = vld [vmem:[%s1490_s7] ss:$0 sm:$0xff] }
  0x53   :  { %1187 = vmatprep.subr.bf16.mxu1 %v1319_v17 }
  0x54   :  { %694 = vmatmul.mubr.bf16.vlgmr.msra.gmra.mrb[4].mxu0 %v58_v14 }
  0x55   :  { %734 = vmatmul.mubr.bf16.vlgmr.msra.gmra.mrb[4].mxu1 %v60_v15  ;;  %1168 = vmatpush3.bf16.msra.mxu0 %v1276_v16 }
  0x56   :  { %1169 = vmatprep.subr.bf16.mxu0 %v1319_v17  ;;  %1183 = vmatprep.mubr.msk.bf16.mxu0 %vm1320_vm0, %v1319_v17 }
  0x57   :  { %1203 = vmatprep.mubr.msk.bf16.mxu1 %vm1320_vm0, %v1319_v17  ;;  %1188 = vmatpush3.bf16.msra.mxu1 %v1284_v25 }
  0x58   :  { %1189 = vmatprep.subr.bf16.mxu1 %v1319_v17 }
  0x59   :  { %1170 = vmatpush3.bf16.msra.mxu0 %v1277_v18 }
  0x5a   :  { %1171 = vmatprep.subr.bf16.mxu0 %v1319_v17 }
  0x5b   :  { %1190 = vmatpush3.bf16.msra.mxu1 %v1285_v26 }
  0x5c   :  { %1191 = vmatprep.subr.bf16.mxu1 %v1319_v17 }
  0x5d   :  { %1172 = vmatpush3.bf16.msra.mxu0 %v1278_v19 }
  0x5e   :  { %1173 = vmatprep.subr.bf16.mxu0 %v1319_v17 }
  0x5f   :  { %1192 = vmatpush3.bf16.msra.mxu1 %v1286_v27 }
  0x60   :  { %1193 = vmatprep.subr.bf16.mxu1 %v1319_v17 }
  0x61   :  { %1174 = vmatpush3.bf16.msra.mxu0 %v1279_v20 }
  0x62   :  { %1175 = vmatprep.subr.bf16.mxu0 %v1319_v17 }
  0x63   :  { %1194 = vmatpush3.bf16.msra.mxu1 %v1287_v28 }
  0x64   :  { %1195 = vmatprep.subr.bf16.mxu1 %v1319_v17 }
  0x65   :  { %1176 = vmatpush3.bf16.msra.mxu0 %v1280_v21 }
  0x66   :  { %1177 = vmatprep.subr.bf16.mxu0 %v1319_v17 }
  0x67   :  { %1196 = vmatpush3.bf16.msra.mxu1 %v1288_v29 }
  0x68   :  { %1197 = vmatprep.subr.bf16.mxu1 %v1319_v17 }
  0x69   :  { %1178 = vmatpush3.bf16.msra.mxu0 %v1281_v22 }
  0x6a   :  { %1179 = vmatprep.subr.bf16.mxu0 %v1319_v17 }
  0x6b   :  { %1198 = vmatpush3.bf16.msra.mxu1 %v1289_v30 }
  0x6c   :  { %1199 = vmatprep.subr.bf16.mxu1 %v1319_v17 }
  0x6d   :  { %1180 = vmatpush3.bf16.msra.mxu0 %v1282_v23 }
  0x6e   :  { %1181 = vmatprep.subr.bf16.mxu0 %v1319_v17 }
  0x6f   :  { %1200 = vmatpush3.bf16.msra.mxu1 %v1290_v60 }
  0x70   :  { %1201 = vmatprep.subr.bf16.mxu1 %v1319_v17 }
  0x71   :  { %1182 = vmatpush3.bf16.msra.mxu0 %v1283_v24 }
  0x73   :  { %1202 = vmatpush3.bf16.msra.mxu1 %v1291_v61 }
 0x107   :  { %v1077_v31 = vpop.f32.mrb[0].mxu0 }
 0x108   :  { %v1099_v32 = vpop.f32.mrb[0].mxu1  ;;  %v1078_v34 = vpop.f32.mrb[1].mxu0 }
 0x109   :  { %v1100_v35 = vpop.f32.mrb[1].mxu1  ;;  %v1079_v36 = vadd.f32 %v1078_v34, %v1077_v31  ;;  %v1080_v38 = vpop.f32.mrb[2].mxu0 }
 0x10a   :  { %v1101_v37 = vadd.f32 %v1100_v35, %v1099_v32  ;;  %v1102_v39 = vpop.f32.mrb[2].mxu1  ;;  %v1081_v40 = vpop.f32.mrb[3].mxu0 }
 0x10b   :  { %v1103_v41 = vpop.f32.mrb[3].mxu1  ;;  %v616_v42 = vadd.f32 %v1079_v36, %v978_v33 }
 0x10d   :  { %v656_v43 = vadd.f32 %v1101_v37, %v616_v42 }
 0x127   :  { %v1121_v44 = vpop.f32.mrb[4].mxu0 }
 0x128   :  { %v1143_v45 = vpop.f32.mrb[4].mxu1  ;;  %v1122_v46 = vpop.f32.mrb[5].mxu0 }
 0x129   :  { %v1123_v47 = vadd.f32 %v1122_v46, %v1121_v44  ;;  %v1144_v48 = vpop.f32.mrb[5].mxu1  ;;  %v1124_v49 = vpop.f32.mrb[6].mxu0 }
 0x12a   :  { %v1145_v50 = vadd.f32 %v1144_v48, %v1143_v45  ;;  %v1146_v51 = vpop.f32.mrb[6].mxu1  ;;  %v1125_v52 = vpop.f32.mrb[7].mxu0 }
 0x12b   :  { %v696_v53 = vadd.f32 %v1123_v47, %v656_v43  ;;  %v1147_v54 = vpop.f32.mrb[7].mxu1 }
 0x12d   :  { %v736_v55 = vadd.f32 %v1145_v50, %v696_v53 }
 0x12f   :  { %vm741_vm1 = vcmp.ge.f32.partialorder %v736_v55, 0.0 }
 0x130   :  { %v743_v57 = vsel %vm741_vm1, 1.0, %v742_v56 }
 0x131   :  { %v744_v58 = vmul.f32 %v743_v57, %v736_v55 }
 0x133   :  { %v745_v59 = vpack.c.bf16 %v744_v58, %v744_v58 }
 0x135   :  { %1184 = vmatmul.mubr.bf16.vlgmr.msra.gmra.mrb[8].mxu0 %v745_v59 }
 0x208   :  { %v851_v63 = vpop.f32.mrb[8].mxu0 }
 0x209   :  { %v852_v0 = vadd.f32 %v1043_v62, %v851_v63  ;;  %v1185_v1 = vpop.f32.mrb[9].mxu0 }
 0x20a   :  { %v854_v2 = vpop.f32.mrb[10].mxu0 }
 0x20b   :  { %vm857_vm2 = vcmp.ge.f32.partialorder %v852_v0, 0.0  ;;  %v1186_v3 = vpop.f32.mrb[11].mxu0 }
 0x20c   :  { %v858_v4 = vsel %vm857_vm2, 1.0, %v742_v56 }
 0x20d   :  { %v859_v5 = vmul.f32 %v858_v4, %v852_v0 }
 0x20f   :  { %v860_v6 = vpack.c.bf16 %v859_v5, %v859_v5 }
 0x211   :  { %1204 = vmatmul.mubr.bf16.vlgmr.msra.gmra.mrb[8].mxu1 %v860_v6 }
 0x2e4   :  { %v966_v8 = vpop.f32.mrb[8].mxu1 }
 0x2e5   :  { %v967_v9 = vadd.f32 %v1052_v7, %v966_v8  ;;  %v1205_v10 = vpop.f32.mrb[9].mxu1 }
 0x2e6   :  { %v969_v11 = vpop.f32.mrb[10].mxu1 }
 0x2e7   :  { %972 = vst [vmem:[%s1491_s8] sm:$0xff] %v967_v9  ;;  %v1206_v12 = vpop.f32.mrb[11].mxu1 }
 0x2e8   :  { %977 = vsyncpa [#allocation4], 1 }

</bundles_post_ra>
